<compile_context>
chip_gen: v7x
topology: tpu7x:2x2x1
jax: 0.10.0
libtpu: 0.0.40
codegen_flags: <defaults>
</compile_context>

<pallas_src>
import jax
import jax.numpy as jnp
from jax.experimental import pallas as pl
from jax.experimental.pallas import tpu as pltpu


# --------------------------------- constants ---------------------------------

TOTAL_LOCATIONS = 3025
TIME_SCALE = 48
LOC_DIM, TIM_DIM, ACT_DIM, STAY_DIM, PRE_DIM = 64, 8, 4, 8, 8
EMB_DIM = LOC_DIM + TIM_DIM + ACT_DIM + PRE_DIM + STAY_DIM   # 92
EMB_PAD = pl.cdiv(EMB_DIM, 128) * 128                        # 128 (lane aligned)
HIDDEN = 64


# ----------------------------- Pallas kernel ---------------------------------

def _disc_mlp_kernel(x_ref, w1_ref, b1_ref, w2_ref, b2_ref,
                     w3_ref, b3_ref, w4t_ref, b4_ref, o_ref):
    """One (tm, 128) row tile of the MLP: 3x(Linear+ReLU) -> Linear -> Sigmoid.

    Output block is (1, tm): the last layer is computed transposed so the
    result is lane-dense and stored with full-vreg (unmasked) stores.
    """
    x = x_ref[...]                                                     # (tm, 128)
    h = jnp.dot(x, w1_ref[...], preferred_element_type=jnp.float32) + b1_ref[...]
    h = jnp.maximum(h, 0.0)
    h = jnp.dot(h, w2_ref[...], preferred_element_type=jnp.float32) + b2_ref[...]
    h = jnp.maximum(h, 0.0)
    h = jnp.dot(h, w3_ref[...], preferred_element_type=jnp.float32) + b3_ref[...]
    h = jnp.maximum(h, 0.0)                                            # (tm, H)

    # Final layer transposed: (1, H) @ (H, tm) -> (1, tm)  (lane-dense result).
    h_t = h.T                                                          # XLU transpose
    logit = jnp.dot(w4t_ref[...], h_t,
                    preferred_element_type=jnp.float32) + b4_ref[0]    # (1, tm)

    # Sigmoid: exp and approx reciprocal both run on the EUP slot.
    o_ref[...] = pl.reciprocal(1.0 + jnp.exp(-logit), approx=True)


def _choose_tm(n_rows, tm_max=1024):
    """Row-tile size: large (amortize ~0.35us/step pipeline overhead and give
    the MXU a big M), a multiple of 128 always (lane-dense output blocks) and
    of 256 when possible (MXU M on v6e/v7x), capped at ~N/2 so the "parallel"
    grid keeps at least 2 steps for the two v7x TensorCores."""
    half = pl.cdiv(n_rows, 2)
    if half <= 128:
        return 128
    return min(tm_max, pl.cdiv(half, 256) * 256)


def disc_mlp_pallas(x, params, *, tm=None):
    """x: (N, E) float32 features (E = 92 or already padded to 128).
    Returns (N,) float32 sigmoid outputs."""
    n, e = x.shape
    hdim = params["w1"].shape[1]
    if tm is None:
        tm = _choose_tm(n)

    # Lane-align the feature dim (92 -> 128) with zero columns; give W1
    # matching zero rows (exact: the extra K rows contribute nothing).
    e_pad = pl.cdiv(e, 128) * 128
    if e_pad != e:
        x = jnp.pad(x, ((0, 0), (0, e_pad - e)))
    w1 = params["w1"]
    if w1.shape[0] != e_pad:
        w1 = jnp.pad(w1, ((0, e_pad - w1.shape[0]), (0, 0)))

    # Pad rows up to a multiple of the row tile.
    n_pad = pl.cdiv(n, tm) * tm
    if n_pad != n:
        x = jnp.pad(x, ((0, n_pad - n), (0, 0)))

    w4_t = params["w4"].T                 # (1, H)
    b4 = params["b4"].reshape(1)          # (1,) scalar -> SMEM

    full = lambda i: (0, 0)
    out = pl.pallas_call(
        _disc_mlp_kernel,
        out_shape=jax.ShapeDtypeStruct((1, n_pad), jnp.float32),
        grid_spec=pltpu.PrefetchScalarGridSpec(
            num_scalar_prefetch=0,
            grid=(n_pad // tm,),
            in_specs=[
                pl.BlockSpec((tm, e_pad), lambda i: (i, 0)),          # x row tile
                pl.BlockSpec((e_pad, hdim), full),                    # w1 (padded)
                pl.BlockSpec((1, hdim), full),                        # b1
                pl.BlockSpec((hdim, hdim), full),                     # w2
                pl.BlockSpec((1, hdim), full),                        # b2
                pl.BlockSpec((hdim, hdim), full),                     # w3
                pl.BlockSpec((1, hdim), full),                        # b3
                pl.BlockSpec((1, hdim), full),                        # w4^T
                pl.BlockSpec(memory_space=pltpu.MemorySpace.SMEM),    # b4 scalar
            ],
            out_specs=pl.BlockSpec((1, tm), lambda i: (0, i)),        # lane-dense
        ),
        compiler_params=pltpu.CompilerParams(
            dimension_semantics=("parallel",)),
    )(x, w1, params["b1"], params["w2"], params["b2"],
      params["w3"], params["b3"], w4_t, b4)
    return out[0, :n]


# --------------------------- Parameter construction --------------------------

def init_params(key):
    ks = jax.random.split(key, 14)

    def emb(k, num, dim):
        return jax.random.normal(k, (num, dim), jnp.float32)  # N(0,1) like nn.Embedding

    def linear(kw, kb, fan_in, fan_out):
        bound = 1.0 / jnp.sqrt(fan_in)
        w = jax.random.uniform(kw, (fan_in, fan_out), jnp.float32, -bound, bound)
        b = jax.random.uniform(kb, (1, fan_out), jnp.float32, -bound, bound)
        return w, b

    params = {
        "loc_emb": emb(ks[0], TOTAL_LOCATIONS, LOC_DIM),
        "tim_emb": emb(ks[1], TIME_SCALE, TIM_DIM),
        "act_emb": emb(ks[2], 4, ACT_DIM),
        "stay_emb": emb(ks[3], TIME_SCALE, STAY_DIM),
        "pre_emb": emb(ks[4], TIME_SCALE, PRE_DIM),
    }
    params["w1"], params["b1"] = linear(ks[5], ks[6], EMB_DIM, HIDDEN)
    params["w2"], params["b2"] = linear(ks[7], ks[8], HIDDEN, HIDDEN)
    params["w3"], params["b3"] = linear(ks[9], ks[10], HIDDEN, HIDDEN)
    params["w4"], params["b4"] = linear(ks[11], ks[12], HIDDEN, 1)
    return params


# ------------------------------ Forward pass ---------------------------------

def discriminator_forward(params, x_l, x_t, x_a, pre_pos_count, stay_time):
    """Mirrors Discriminator.forward; inputs are int32 index arrays of identical
    shape (e.g. (batch, seq)); returns sigmoid reward of shape (*input, 1)."""
    lemb = jnp.take(params["loc_emb"], x_l, axis=0)
    temb = jnp.take(params["tim_emb"], x_t, axis=0)
    aemb = jnp.take(params["act_emb"], x_a, axis=0)
    semb = jnp.take(params["stay_emb"], stay_time, axis=0)
    pemb = jnp.take(params["pre_emb"], pre_pos_count, axis=0)
    # Concatenate in the same order as torch.cat and zero-pad the feature dim
    # to 128 in the same materialization (lane-aligned DMAs into the kernel).
    zpad = jnp.zeros(lemb.shape[:-1] + (EMB_PAD - EMB_DIM,), jnp.float32)
    x = jnp.concatenate([lemb, temb, aemb, semb, pemb, zpad], axis=-1)  # (..., 128)

    lead_shape = x.shape[:-1]
    x_flat = x.reshape(-1, EMB_PAD).astype(jnp.float32)
    reward_flat = disc_mlp_pallas(x_flat, params)                       # (N,)
    return reward_flat.reshape(*lead_shape, 1)


def discriminator_forward_ref(params, x_l, x_t, x_a, pre_pos_count, stay_time):
    """Pure-JAX reference for validation."""
    lemb = jnp.take(params["loc_emb"], x_l, axis=0)
    temb = jnp.take(params["tim_emb"], x_t, axis=0)
    aemb = jnp.take(params["act_emb"], x_a, axis=0)
    semb = jnp.take(params["stay_emb"], stay_time, axis=0)
    pemb = jnp.take(params["pre_emb"], pre_pos_count, axis=0)
    x = jnp.concatenate([lemb, temb, aemb, semb, pemb], axis=-1)
    h = jax.nn.relu(x @ params["w1"] + params["b1"][0])
    h = jax.nn.relu(h @ params["w2"] + params["b2"][0])
    h = jax.nn.relu(h @ params["w3"] + params["b3"][0])
    return jax.nn.sigmoid(h @ params["w4"] + params["b4"][0])


# ----------------------------------- main -------------------------------------

if __name__ == "__main__":
    key = jax.random.PRNGKey(0)
    params = init_params(key)

    batch, seq = 2, 8
    k1, k2, k3, k4, k5 = jax.random.split(jax.random.PRNGKey(42), 5)
    x_l = jax.random.randint(k1, (batch, seq), 0, TOTAL_LOCATIONS, jnp.int32)
    x_t = jax.random.randint(k2, (batch, seq), 0, TIME_SCALE, jnp.int32)
    x_a = jax.random.randint(k3, (batch, seq), 0, 4, jnp.int32)
    pre_pos_count = jax.random.randint(k4, (batch, seq), 0, TIME_SCALE, jnp.int32)
    stay_time = jax.random.randint(k5, (batch, seq), 0, TIME_SCALE, jnp.int32)

    reward = discriminator_forward(params, x_l, x_t, x_a, pre_pos_count, stay_time)
    reward = jax.block_until_ready(reward)

    ref = discriminator_forward_ref(params, x_l, x_t, x_a, pre_pos_count, stay_time)
    assert reward.shape == (batch, seq, 1)
    # Tolerance accounts for the approx (EUP) reciprocal in the sigmoid epilogue.
    assert jnp.max(jnp.abs(reward - ref)) < 2e-3

    print("KERNEL_OK")
</pallas_src>

<mosaic_0001>
module attributes {stable_mosaic.version = 11 : i64} {
  func.func @_disc_mlp_kernel(%arg0: i32, %arg1: memref<128x128xf32, #tpu.memory_space<vmem>>, %arg2: memref<128x64xf32, #tpu.memory_space<vmem>>, %arg3: memref<1x64xf32, #tpu.memory_space<vmem>>, %arg4: memref<64x64xf32, #tpu.memory_space<vmem>>, %arg5: memref<1x64xf32, #tpu.memory_space<vmem>>, %arg6: memref<64x64xf32, #tpu.memory_space<vmem>>, %arg7: memref<1x64xf32, #tpu.memory_space<vmem>>, %arg8: memref<1x64xf32, #tpu.memory_space<vmem>>, %arg9: memref<1xf32, #tpu.memory_space<smem>>, %arg10: memref<1x128xf32, #tpu.memory_space<vmem>>) attributes {dimension_semantics = [#tpu.dimension_semantics<parallel>], iteration_bounds = array<i64: 1>, scalar_prefetch = 0 : i64, scratch_operands = 0 : i64, tpu.core_type = #tpu.core_type<tc>, window_params = [{transform_indices = @transform_0, window_bounds = array<i64: 128, 128>}, {pipeline_mode = #tpu.pipeline_mode<synchronous>, transform_indices = @transform_1, window_bounds = array<i64: 128, 64>}, {pipeline_mode = #tpu.pipeline_mode<synchronous>, transform_indices = @transform_2, window_bounds = array<i64: 1, 64>}, {pipeline_mode = #tpu.pipeline_mode<synchronous>, transform_indices = @transform_3, window_bounds = array<i64: 64, 64>}, {pipeline_mode = #tpu.pipeline_mode<synchronous>, transform_indices = @transform_4, window_bounds = array<i64: 1, 64>}, {pipeline_mode = #tpu.pipeline_mode<synchronous>, transform_indices = @transform_5, window_bounds = array<i64: 64, 64>}, {pipeline_mode = #tpu.pipeline_mode<synchronous>, transform_indices = @transform_6, window_bounds = array<i64: 1, 64>}, {pipeline_mode = #tpu.pipeline_mode<synchronous>, transform_indices = @transform_7, window_bounds = array<i64: 1, 64>}, {transform_indices = @transform_8, window_bounds = array<i64: 1>}, {transform_indices = @transform_9, window_bounds = array<i64: 1, 128>}]} {
    %c0 = arith.constant 0 : index
    %c0_0 = arith.constant 0 : index
    %0 = vector.load %arg1[%c0, %c0_0] : memref<128x128xf32, #tpu.memory_space<vmem>>, vector<128x128xf32>
    %c0_1 = arith.constant 0 : index
    %c0_2 = arith.constant 0 : index
    %1 = vector.load %arg2[%c0_1, %c0_2] : memref<128x64xf32, #tpu.memory_space<vmem>>, vector<128x64xf32>
    %cst = arith.constant dense<0.000000e+00> : vector<128x64xf32>
    %2 = tpu.matmul %0, %1, %cst {dimension_numbers = #tpu.dot_dimension_numbers<[1], [0], [0], [1], [0, 0, 1, 1], [], []>} : vector<128x128xf32>, vector<128x64xf32>, vector<128x64xf32> -> vector<128x64xf32>
    %c0_3 = arith.constant 0 : index
    %c0_4 = arith.constant 0 : index
    %3 = vector.load %arg3[%c0_3, %c0_4] : memref<1x64xf32, #tpu.memory_space<vmem>>, vector<1x64xf32>
    %4 = vector.broadcast %3 : vector<1x64xf32> to vector<128x64xf32>
    %5 = arith.addf %2, %4 : vector<128x64xf32>
    %cst_5 = arith.constant 0.000000e+00 : f32
    %6 = vector.broadcast %cst_5 : f32 to vector<128x64xf32>
    %7 = arith.maximumf %5, %6 : vector<128x64xf32>
    %c0_6 = arith.constant 0 : index
    %c0_7 = arith.constant 0 : index
    %8 = vector.load %arg4[%c0_6, %c0_7] : memref<64x64xf32, #tpu.memory_space<vmem>>, vector<64x64xf32>
    %cst_8 = arith.constant dense<0.000000e+00> : vector<128x64xf32>
    %9 = tpu.matmul %7, %8, %cst_8 {dimension_numbers = #tpu.dot_dimension_numbers<[1], [0], [0], [1], [0, 0, 1, 1], [], []>} : vector<128x64xf32>, vector<64x64xf32>, vector<128x64xf32> -> vector<128x64xf32>
    %c0_9 = arith.constant 0 : index
    %c0_10 = arith.constant 0 : index
    %10 = vector.load %arg5[%c0_9, %c0_10] : memref<1x64xf32, #tpu.memory_space<vmem>>, vector<1x64xf32>
    %11 = vector.broadcast %10 : vector<1x64xf32> to vector<128x64xf32>
    %12 = arith.addf %9, %11 : vector<128x64xf32>
    %cst_11 = arith.constant 0.000000e+00 : f32
    %13 = vector.broadcast %cst_11 : f32 to vector<128x64xf32>
    %14 = arith.maximumf %12, %13 : vector<128x64xf32>
    %c0_12 = arith.constant 0 : index
    %c0_13 = arith.constant 0 : index
    %15 = vector.load %arg6[%c0_12, %c0_13] : memref<64x64xf32, #tpu.memory_space<vmem>>, vector<64x64xf32>
    %cst_14 = arith.constant dense<0.000000e+00> : vector<128x64xf32>
    %16 = tpu.matmul %14, %15, %cst_14 {dimension_numbers = #tpu.dot_dimension_numbers<[1], [0], [0], [1], [0, 0, 1, 1], [], []>} : vector<128x64xf32>, vector<64x64xf32>, vector<128x64xf32> -> vector<128x64xf32>
    %c0_15 = arith.constant 0 : index
    %c0_16 = arith.constant 0 : index
    %17 = vector.load %arg7[%c0_15, %c0_16] : memref<1x64xf32, #tpu.memory_space<vmem>>, vector<1x64xf32>
    %18 = vector.broadcast %17 : vector<1x64xf32> to vector<128x64xf32>
    %19 = arith.addf %16, %18 : vector<128x64xf32>
    %cst_17 = arith.constant 0.000000e+00 : f32
    %20 = vector.broadcast %cst_17 : f32 to vector<128x64xf32>
    %21 = arith.maximumf %19, %20 : vector<128x64xf32>
    %22 = tpu.transpose %21, [1, 0] : vector<128x64xf32> -> vector<64x128xf32>
    %c0_18 = arith.constant 0 : index
    %c0_19 = arith.constant 0 : index
    %23 = vector.load %arg8[%c0_18, %c0_19] : memref<1x64xf32, #tpu.memory_space<vmem>>, vector<1x64xf32>
    %cst_20 = arith.constant dense<0.000000e+00> : vector<1x128xf32>
    %24 = tpu.matmul %23, %22, %cst_20 {dimension_numbers = #tpu.dot_dimension_numbers<[1], [0], [0], [1], [0, 0, 1, 1], [], []>} : vector<1x64xf32>, vector<64x128xf32>, vector<1x128xf32> -> vector<1x128xf32>
    %c0_21 = arith.constant 0 : index
    %25 = memref.load %arg9[%c0_21] : memref<1xf32, #tpu.memory_space<smem>>
    %26 = vector.broadcast %25 : f32 to vector<1x128xf32>
    %27 = arith.addf %24, %26 : vector<1x128xf32>
    %cst_22 = arith.constant 0.000000e+00 : f32
    %28 = vector.broadcast %cst_22 : f32 to vector<1x128xf32>
    %29 = arith.subf %28, %27 : vector<1x128xf32>
    %30 = math.exp %29 : vector<1x128xf32>
    %cst_23 = arith.constant 1.000000e+00 : f32
    %31 = vector.broadcast %cst_23 : f32 to vector<1x128xf32>
    %32 = arith.addf %31, %30 : vector<1x128xf32>
    %33 = tpu.reciprocal %32 {approx = true} : vector<1x128xf32> -> vector<1x128xf32>
    %c0_24 = arith.constant 0 : index
    %c0_25 = arith.constant 0 : index
    %34 = vector.load %arg10[%c0_24, %c0_25] : memref<1x128xf32, #tpu.memory_space<vmem>>, vector<1x128xf32>
    tpu.vector_store %arg10[%c0_24, %c0_25], %33 {strides = array<i32>} : memref<1x128xf32, #tpu.memory_space<vmem>>, vector<1x128xf32>,
    return
  }
  func.func @transform_0(%arg0: i32) -> (i32, i32) {
    %c0_i32 = arith.constant 0 : i32
    %c0_i32_0 = arith.constant 0 : i32
    return %arg0, %c0_i32 : i32, i32
  }
  func.func @transform_1(%arg0: i32) -> (i32, i32) {
    %c0_i32 = arith.constant 0 : i32
    %c0_i32_0 = arith.constant 0 : i32
    %c0_i32_1 = arith.constant 0 : i32
    return %c0_i32, %c0_i32_0 : i32, i32
  }
  func.func @transform_2(%arg0: i32) -> (i32, i32) {
    %c0_i32 = arith.constant 0 : i32
    %c0_i32_0 = arith.constant 0 : i32
    %c0_i32_1 = arith.constant 0 : i32
    return %c0_i32, %c0_i32_0 : i32, i32
  }
  func.func @transform_3(%arg0: i32) -> (i32, i32) {
    %c0_i32 = arith.constant 0 : i32
    %c0_i32_0 = arith.constant 0 : i32
    %c0_i32_1 = arith.constant 0 : i32
    return %c0_i32, %c0_i32_0 : i32, i32
  }
  func.func @transform_4(%arg0: i32) -> (i32, i32) {
    %c0_i32 = arith.constant 0 : i32
    %c0_i32_0 = arith.constant 0 : i32
    %c0_i32_1 = arith.constant 0 : i32
    return %c0_i32, %c0_i32_0 : i32, i32
  }
  func.func @transform_5(%arg0: i32) -> (i32, i32) {
    %c0_i32 = arith.constant 0 : i32
    %c0_i32_0 = arith.constant 0 : i32
    %c0_i32_1 = arith.constant 0 : i32
    return %c0_i32, %c0_i32_0 : i32, i32
  }
  func.func @transform_6(%arg0: i32) -> (i32, i32) {
    %c0_i32 = arith.constant 0 : i32
    %c0_i32_0 = arith.constant 0 : i32
    %c0_i32_1 = arith.constant 0 : i32
    return %c0_i32, %c0_i32_0 : i32, i32
  }
  func.func @transform_7(%arg0: i32) -> (i32, i32) {
    %c0_i32 = arith.constant 0 : i32
    %c0_i32_0 = arith.constant 0 : i32
    %c0_i32_1 = arith.constant 0 : i32
    return %c0_i32, %c0_i32_0 : i32, i32
  }
  func.func @transform_8(%arg0: i32) -> i32 {
    %c0_i32 = arith.constant 0 : i32
    %c0_i32_0 = arith.constant 0 : i32
    return %c0_i32 : i32
  }
  func.func @transform_9(%arg0: i32) -> (i32, i32) {
    %c0_i32 = arith.constant 0 : i32
    %c0_i32_0 = arith.constant 0 : i32
    return %c0_i32, %arg0 : i32, i32
  }
}

</mosaic_0001>

<bundles_post_ra>
// kernel: tpu_custom_call.1
= control target key start
LH: loop header
LB: loop body
LE: loop exit
PB: predicated region body
PF: predicated region fallthrough
CT: control target
= control target key end

     0   :  { %15 = vsyncpa [#allocation4], 0  ;;  %s1614_s0 = inlined_call_operand.vmem [shape: f32[128,128], index: 0, kind: input, shape index: {}]   ;;  %s1615_s1 = inlined_call_operand.vmem [shape: f32[128,64], index: 1, kind: input, shape index: {}]   ;;  %s1616_s2 = inlined_call_operand.vmem [shape: f32[1,64], index: 2, kind: input, shape index: {}]   ;;  %s1617_s3 = inlined_call_operand.vmem [shape: f32[64,64], index: 3, kind: input, shape index: {}]   ;;  %s1618_s4 = inlined_call_operand.vmem [shape: f32[1,64], index: 4, kind: input, shape index: {}]   ;;  %s1619_s5 = inlined_call_operand.hbm [shape: f32[64,64], index: 5, kind: input, shape index: {}]   ;;  %s1620_s6 = inlined_call_operand.vmem [shape: f32[1,64], index: 6, kind: input, shape index: {}]   ;;  %s1621_s7 = inlined_call_operand.vmem [shape: f32[1,64], index: 7, kind: input, shape index: {}]   ;;  %s1622_s8 = inlined_call_operand.<no memory space> [shape: f32[1], index: 8, kind: input, shape index: {}]   ;;  %s1623_s9 = inlined_call_operand.hbm [shape: f32[1,128], index: 9, kind: output, shape index: {}]  }
   0x1   :  { %16 = vsyncpa [#allocation5], 0  ;;  %s1317_s30 = smov [#allocation3]   ;;  %s1269_s13 = scalar_lea.hbm %s1619_s5, 1024 }
   0x2   :  { %s32_s10 = sshll.u32 %s1317_s30, 4  ;;  %p1270_p0 = scmp.ne.s32.totalorder %s1619_s5, %s1269_s13  ;;  %s33_s10 = int_to_ptr.vmem [resolvable:$true] %s32_s10 }
   0x3   :  { %p1273_p1 = scmp.lt.u32.totalorder %s1269_s13, %s1619_s5 }
   0x5   :  { %p1275_p2 = pnand %p1273_p1, %p1270_p0 }
   0x7   :  { %1278 = shalt.err (!%p1275_p2)
}
   0x8   :  { %s1279_s18 = scalar_lea.vmem %s33_s10, 1024  ;;  %p1284_p4 = scmp.lt.s32.totalorder %s33_s10, %s33_s10 }
   0x9   :  { %p1280_p3 = scmp.ne.s32.totalorder %s33_s10, %s1279_s18  ;;  %p1285_p5 = scmp.lt.s32.totalorder %s1279_s18, %s1279_s18 }
   0xb   :  { %p1286_p6 = por %p1285_p5, %p1284_p4 }
   0xd   :  { %p1287_p7 = pnand %p1286_p6, %p1280_p3 }
   0xf   :  { %1290 = shalt.err (!%p1287_p7)
}
  0x10   :  { %s1318_s19 = smov 128   ;;  %s1319_s20 = smov 8  }
  0x11   :  { %38 = dma.hbm_to_vmem [thread:$0]  %s1619_s5, 1024, %s33_s10, [#allocation4], %s1318_s19, %s1318_s19, %s1319_s20  }
  0x12   :  { %1313 = dma.done.wait [#allocation4], 1024  }
  0x13   :  { %1314 = vsyncadd [#allocation4], 4294966272  ;;  %v64_v0 = vld [vmem:[%s1615_s1] sm:$0xff]  ;;  %v65_v1 = vld [vmem:[%s1615_s1 + $0x8] sm:$0xff]  ;;  %vm263_vm0 = vcmask 523264   ;;  %vm1321_vm1 = vmmov 0  }
  0x14   :  { %v66_v2 = vld [vmem:[%s1615_s1 + $0x10] sm:$0xff]  ;;  %v1162_v3 = vpack.c.bf16 %v65_v1, %v64_v0  ;;  %v67_v4 = vld [vmem:[%s1615_s1 + $0x18] sm:$0xff]  ;;  %v68_v6 = vld [vmem:[%s1615_s1 + $0x20] sm:$0xff]  ;;  %s1323_s18 = smov [#allocation6]  }
  0x15   :  { %v1166_v5 = vpack.c.bf16 %v67_v4, %v66_v2  ;;  %v69_v7 = vld [vmem:[%s1615_s1 + $0x28] sm:$0xff]  ;;  %v48_v9 = vld [vmem:[%s1614_s0] sm:$0xff]  ;;  %v70_v10 = vld [vmem:[%s1615_s1 + $0x30] sm:$0xff]  ;;  %s833_s19 = sshll.u32 %s1323_s18, 4  ;;  %s834_s19 = int_to_ptr.vmem [resolvable:$true] %s833_s19 }
  0x16   :  { %1163 = vmatprep.subr.bf16.mxu0 %v1162_v3  ;;  %v1170_v8 = vpack.c.bf16 %v69_v7, %v68_v6  ;;  %v71_v11 = vld [vmem:[%s1615_s1 + $0x38] sm:$0xff]  ;;  %1023 = vmatprep.mubr.f32.mxu0 %v48_v9  ;;  %v72_v13 = vld [vmem:[%s1615_s1 + $0x40] sm:$0xff]  ;;  %v73_v14 = vld [vmem:[%s1615_s1 + $0x48] sm:$0xff]  ;;  %s1295_s20 = scalar_lea.vmem %s834_s19, 32  ;;  %p1296_p9 = scmp.lt.s32.totalorder %s834_s19, %s834_s19 }
  0x17   :  { %1165 = vmatpush3.bf16.msra.mxu0 %v1162_v3  ;;  %v1174_v12 = vpack.c.bf16 %v71_v11, %v70_v10  ;;  %v248_v15 = vld [vmem:[%s1617_s3] sm:$0xff]  ;;  %v249_v16 = vld [vmem:[%s1617_s3 + $0x8] sm:$0xff]  ;;  %v250_v17 = vld [vmem:[%s1617_s3 + $0x10] sm:$0xff]  ;;  %v1178_v21 = vpack.c.bf16 %v73_v14, %v72_v13 }
  0x18   :  { %1167 = vmatprep.subr.bf16.mxu0 %v1166_v5  ;;  %v251_v18 = vld [vmem:[%s1617_s3 + $0x18] sm:$0xff]  ;;  %v1194_v19 = vpack.c.bf16 %v249_v16, %v248_v15  ;;  %v252_v22 = vld [vmem:[%s1617_s3 + $0x20] sm:$0xff]  ;;  %v253_v23 = vld [vmem:[%s1617_s3 + $0x28] sm:$0xff] }
  0x19   :  { %v1198_v20 = vpack.c.bf16 %v251_v18, %v250_v17  ;;  %v74_v24 = vld [vmem:[%s1615_s1 + $0x50] sm:$0xff]  ;;  %v75_v25 = vld [vmem:[%s1615_s1 + $0x58] sm:$0xff]  ;;  %v1202_v26 = vpack.c.bf16 %v253_v23, %v252_v22  ;;  %v76_v28 = vld [vmem:[%s1615_s1 + $0x60] sm:$0xff] }
  0x1a   :  { %1195 = vmatprep.subr.bf16.mxu1 %v1194_v19  ;;  %v1182_v27 = vpack.c.bf16 %v75_v25, %v74_v24  ;;  %v77_v29 = vld [vmem:[%s1615_s1 + $0x68] sm:$0xff]  ;;  %v78_v31 = vld [vmem:[%s1615_s1 + $0x70] sm:$0xff]  ;;  %v79_v32 = vld [vmem:[%s1615_s1 + $0x78] sm:$0xff] }
  0x1b   :  { %1169 = vmatpush3.bf16.msra.mxu0 %v1166_v5  ;;  %1197 = vmatpush3.bf16.msra.mxu1 %v1194_v19  ;;  %v1186_v30 = vpack.c.bf16 %v77_v29, %v76_v28  ;;  %v1190_v33 = vpack.c.bf16 %v79_v32, %v78_v31  ;;  %v49_v34 = vld [vmem:[%s1614_s0 + $0x8] sm:$0xff]  ;;  %v50_v35 = vld [vmem:[%s1614_s0 + $0x10] sm:$0xff]  ;;  %v51_v36 = vld [vmem:[%s1614_s0 + $0x18] sm:$0xff] }
  0x1c   :  { %1171 = vmatprep.subr.bf16.mxu0 %v1170_v8  ;;  %1199 = vmatprep.subr.bf16.mxu1 %v1198_v20  ;;  %v52_v37 = vld [vmem:[%s1614_s0 + $0x20] sm:$0xff]  ;;  %v53_v38 = vld [vmem:[%s1614_s0 + $0x28] sm:$0xff]  ;;  %v54_v39 = vld [vmem:[%s1614_s0 + $0x30] sm:$0xff] }
  0x1d   :  { %v55_v40 = vld [vmem:[%s1614_s0 + $0x38] sm:$0xff]  ;;  %v56_v41 = vld [vmem:[%s1614_s0 + $0x40] sm:$0xff]  ;;  %v57_v42 = vld [vmem:[%s1614_s0 + $0x48] sm:$0xff] }
  0x1e   :  { %v58_v43 = vld [vmem:[%s1614_s0 + $0x50] sm:$0xff]  ;;  %v59_v44 = vld [vmem:[%s1614_s0 + $0x58] sm:$0xff]  ;;  %v60_v45 = vld [vmem:[%s1614_s0 + $0x60] sm:$0xff] }
  0x1f   :  { %1173 = vmatpush3.bf16.msra.mxu0 %v1170_v8  ;;  %1201 = vmatpush3.bf16.msra.mxu1 %v1198_v20  ;;  %v61_v46 = vld [vmem:[%s1614_s0 + $0x68] sm:$0xff]  ;;  %v62_v47 = vld [vmem:[%s1614_s0 + $0x70] sm:$0xff]  ;;  %v63_v48 = vld [vmem:[%s1614_s0 + $0x78] sm:$0xff] }
  0x20   :  { %1175 = vmatprep.subr.bf16.mxu0 %v1174_v12  ;;  %1203 = vmatprep.subr.bf16.mxu1 %v1202_v26  ;;  %v254_v49 = vld [vmem:[%s1617_s3 + $0x30] sm:$0xff]  ;;  %v255_v50 = vld [vmem:[%s1617_s3 + $0x38] sm:$0xff]  ;;  %v473_v52 = vld [vmem:[#allocation3] sm:$0xff] }
  0x21   :  { %v1206_v51 = vpack.c.bf16 %v255_v50, %v254_v49  ;;  %v474_v53 = vld [vmem:[#allocation3 + $0x8] sm:$0xff]  ;;  %v1509_v55 = vld [vmem:[%s1616_s2] ss:$0 sm:$0xff]  ;;  %v475_v60 = vld [vmem:[#allocation3 + $0x10] sm:$0xff] }
  0x22   :  { %v1210_v54 = vpack.c.bf16 %v474_v53, %v473_v52  ;;  %v476_v61 = vld [vmem:[#allocation3 + $0x18] sm:$0xff]  ;;  %v477_v5 = vld [vmem:[#allocation3 + $0x20] sm:$0xff]  ;;  %v478_v6 = vld [vmem:[#allocation3 + $0x28] sm:$0xff] }
  0x23   :  { %1177 = vmatpush3.bf16.msra.mxu0 %v1174_v12  ;;  %1205 = vmatpush3.bf16.msra.mxu1 %v1202_v26  ;;  %v1214_v3 = vpack.c.bf16 %v476_v61, %v475_v60  ;;  %v1218_v12 = vpack.c.bf16 %v478_v6, %v477_v5  ;;  %v479_v14 = vld [vmem:[#allocation3 + $0x30] sm:$0xff]  ;;  %v480_v15 = vld [vmem:[#allocation3 + $0x38] sm:$0xff]  ;;  %v843_v49 = vld [vmem:[%s1618_s4] ss:$0 sm:$0xff] }
  0x24   :  { %1179 = vmatprep.subr.bf16.mxu0 %v1178_v21  ;;  %1207 = vmatprep.subr.bf16.mxu1 %v1206_v51  ;;  %vm1568_vm2 = vmpackc.low %vm263_vm0, %vm263_vm0 }
  0x27   :  { %1181 = vmatpush3.bf16.msra.mxu0 %v1178_v21  ;;  %1209 = vmatpush3.bf16.msra.mxu1 %v1206_v51  ;;  %v1222_v21 = vpack.c.bf16 %v480_v15, %v479_v14 }
  0x28   :  { %1183 = vmatprep.subr.bf16.mxu0 %v1182_v27  ;;  %1211 = vmatprep.subr.bf16.mxu1 %v1210_v54 }
  0x2b   :  { %1185 = vmatpush3.bf16.msra.mxu0 %v1182_v27 }
  0x2c   :  { %1187 = vmatprep.subr.bf16.mxu0 %v1186_v30 }
  0x2f   :  { %1189 = vmatpush3.bf16.msra.mxu0 %v1186_v30 }
  0x30   :  { %1191 = vmatprep.subr.bf16.mxu0 %v1190_v33 }
  0x33   :  { %1193 = vmatpush3.bf16.msra.mxu0 %v1190_v33 }
  0x36   :  { %1024 = vmatmul.mubr.f32.vlgmr.msra.gmra.mrb[0].mxu0 %v49_v34 }
  0x37   :  { %1026 = vmatprep.mubr.f32.mxu0 %v50_v35 }
  0x3a   :  { %1027 = vmatmul.mubr.f32.gmra.mrb[2].mxu0 %v51_v36 }
  0x3b   :  { %1029 = vmatprep.mubr.f32.mxu0 %v52_v37 }
  0x3e   :  { %1030 = vmatmul.mubr.f32.gmra.mrb[4].mxu0 %v53_v38 }
  0x3f   :  { %1032 = vmatprep.mubr.f32.mxu0 %v54_v39 }
  0x42   :  { %1033 = vmatmul.mubr.f32.gmra.mrb[6].mxu0 %v55_v40 }
  0x43   :  { %1035 = vmatprep.mubr.f32.mxu0 %v56_v41 }
  0x46   :  { %1036 = vmatmul.mubr.f32.gmra.mrb[8].mxu0 %v57_v42 }
  0x47   :  { %1038 = vmatprep.mubr.f32.mxu0 %v58_v43 }
  0x4a   :  { %1039 = vmatmul.mubr.f32.gmra.mrb[10].mxu0 %v59_v44 }
  0x4b   :  { %1041 = vmatprep.mubr.f32.mxu0 %v60_v45 }
  0x4e   :  { %1042 = vmatmul.mubr.f32.gmra.mrb[12].mxu0 %v61_v46 }
  0x4f   :  { %1044 = vmatprep.mubr.f32.mxu0 %v62_v47 }
  0x52   :  { %1045 = vmatmul.mubr.f32.gmra.mrb[14].mxu0 %v63_v48 }
 0x109   :  { %v1025_v56 = vpop.f32.mrb[0].mxu0 }
 0x10a   :  { %v159_v57 = vadd.f32 %v1025_v56, %v1509_v55  ;;  %v153_v58 = vpop.f32.mrb[1].mxu0 }
 0x10b   :  { %v154_v59 = vadd.f32 %v1509_v55, %v153_v58 }
 0x10c   :  { %v233_v0 = vmax.f32 %v159_v57, 0.0 }
 0x10d   :  { %v232_v62 = vmax.f32 %v154_v59, 0.0  ;;  %v1028_v63 = vpop.f32.mrb[2].mxu0 }
 0x10e   :  { %v169_v1 = vadd.f32 %v1028_v63, %v1509_v55  ;;  %v163_v2 = vpop.f32.mrb[3].mxu0 }
 0x10f   :  { %v164_v4 = vadd.f32 %v1509_v55, %v163_v2  ;;  %1063 = vmatprep.mubr.msk.f32.mxu1 %vm263_vm0, %v232_v62 }
 0x110   :  { %v235_v7 = vmax.f32 %v169_v1, 0.0  ;;  %1064 = vmatmul.mubr.msk.f32.vlgmr.msra.gmra.mrb[0].mxu1 %vm263_vm0, %v233_v0 }
 0x111   :  { %v234_v8 = vmax.f32 %v164_v4, 0.0  ;;  %v1031_v9 = vpop.f32.mrb[4].mxu0  ;;  %1213 = vmatpush3.bf16.msra.mxu1 %v1210_v54 }
 0x112   :  { %v179_v10 = vadd.f32 %v1031_v9, %v1509_v55  ;;  %v173_v11 = vpop.f32.mrb[5].mxu0  ;;  %1215 = vmatprep.subr.bf16.mxu1 %v1214_v3 }
 0x113   :  { %1066 = vmatprep.mubr.msk.f32.mxu1 %vm263_vm0, %v234_v8  ;;  %v174_v13 = vadd.f32 %v1509_v55, %v173_v11 }
 0x114   :  { %v237_v16 = vmax.f32 %v179_v10, 0.0  ;;  %1067 = vmatmul.mubr.msk.f32.gmra.mrb[2].mxu1 %vm263_vm0, %v235_v7 }
 0x115   :  { %v236_v17 = vmax.f32 %v174_v13, 0.0  ;;  %v1034_v18 = vpop.f32.mrb[6].mxu0  ;;  %1217 = vmatpush3.bf16.msra.mxu1 %v1214_v3 }
 0x116   :  { %v189_v19 = vadd.f32 %v1034_v18, %v1509_v55  ;;  %v183_v20 = vpop.f32.mrb[7].mxu0  ;;  %1219 = vmatprep.subr.bf16.mxu1 %v1218_v12 }
 0x117   :  { %1069 = vmatprep.mubr.msk.f32.mxu1 %vm263_vm0, %v236_v17  ;;  %v184_v22 = vadd.f32 %v1509_v55, %v183_v20 }
 0x118   :  { %1070 = vmatmul.mubr.msk.f32.gmra.mrb[4].mxu1 %vm263_vm0, %v237_v16  ;;  %v239_v23 = vmax.f32 %v189_v19, 0.0 }
 0x119   :  { %v238_v24 = vmax.f32 %v184_v22, 0.0  ;;  %v1037_v25 = vpop.f32.mrb[8].mxu0  ;;  %1221 = vmatpush3.bf16.msra.mxu1 %v1218_v12 }
 0x11a   :  { %v199_v26 = vadd.f32 %v1037_v25, %v1509_v55  ;;  %v193_v27 = vpop.f32.mrb[9].mxu0  ;;  %1223 = vmatprep.subr.bf16.mxu1 %v1222_v21 }
 0x11b   :  { %1072 = vmatprep.mubr.msk.f32.mxu1 %vm263_vm0, %v238_v24  ;;  %v194_v28 = vadd.f32 %v1509_v55, %v193_v27 }
 0x11c   :  { %1073 = vmatmul.mubr.msk.f32.gmra.mrb[6].mxu1 %vm263_vm0, %v239_v23  ;;  %v241_v29 = vmax.f32 %v199_v26, 0.0 }
 0x11d   :  { %v240_v30 = vmax.f32 %v194_v28, 0.0  ;;  %v1040_v31 = vpop.f32.mrb[10].mxu0  ;;  %1225 = vmatpush3.bf16.msra.mxu1 %v1222_v21 }
 0x11e   :  { %v209_v32 = vadd.f32 %v1040_v31, %v1509_v55  ;;  %v203_v33 = vpop.f32.mrb[11].mxu0 }
 0x11f   :  { %1075 = vmatprep.mubr.msk.f32.mxu1 %vm263_vm0, %v240_v30  ;;  %v204_v34 = vadd.f32 %v1509_v55, %v203_v33 }
 0x120   :  { %1076 = vmatmul.mubr.msk.f32.gmra.mrb[8].mxu1 %vm263_vm0, %v241_v29  ;;  %v243_v35 = vmax.f32 %v209_v32, 0.0 }
 0x121   :  { %v242_v36 = vmax.f32 %v204_v34, 0.0  ;;  %v1043_v37 = vpop.f32.mrb[12].mxu0  ;;  %v1320_v34 = vmov 0.0|0.0  }
 0x122   :  { %v219_v38 = vadd.f32 %v1043_v37, %v1509_v55  ;;  %v213_v39 = vpop.f32.mrb[13].mxu0  ;;  %1226 = vmatprep.subr.bf16.mxu0 %v1320_v34 }
 0x123   :  { %1078 = vmatprep.mubr.msk.f32.mxu1 %vm263_vm0, %v242_v36  ;;  %v214_v40 = vadd.f32 %v1509_v55, %v213_v39  ;;  %v860_v36 = vld [vmem:[%s1620_s6] ss:$0 sm:$0xff] }
 0x124   :  { %1079 = vmatmul.mubr.msk.f32.gmra.mrb[10].mxu1 %vm263_vm0, %v243_v35  ;;  %v245_v41 = vmax.f32 %v219_v38, 0.0  ;;  %v1322_v35 = vmov 0.0  }
 0x125   :  { %v244_v42 = vmax.f32 %v214_v40, 0.0  ;;  %v1046_v43 = vpop.f32.mrb[14].mxu0  ;;  %1159 = vmatprep.mubr.msk.f32.mxu0 %vm1321_vm1, %v1322_v35 }
 0x126   :  { %v229_v44 = vadd.f32 %v1046_v43, %v1509_v55  ;;  %v223_v45 = vpop.f32.mrb[15].mxu0 }
 0x127   :  { %1081 = vmatprep.mubr.msk.f32.mxu1 %vm263_vm0, %v244_v42  ;;  %v224_v46 = vadd.f32 %v1509_v55, %v223_v45 }
 0x128   :  { %1082 = vmatmul.mubr.msk.f32.gmra.mrb[12].mxu1 %vm263_vm0, %v245_v41  ;;  %v247_v47 = vmax.f32 %v229_v44, 0.0 }
 0x129   :  { %v246_v48 = vmax.f32 %v224_v46, 0.0 }
 0x12b   :  { %1084 = vmatprep.mubr.msk.f32.mxu1 %vm263_vm0, %v246_v48 }
 0x12c   :  { %1085 = vmatmul.mubr.msk.f32.gmra.mrb[14].mxu1 %vm263_vm0, %v247_v47 }
 0x1e3   :  { %v1065_v50 = vpop.f32.mrb[0].mxu1 }
 0x1e4   :  { %v384_v51 = vadd.f32 %v1065_v50, %v843_v49  ;;  %v378_v52 = vpop.f32.mrb[1].mxu1 }
 0x1e5   :  { %v379_v53 = vadd.f32 %v843_v49, %v378_v52 }
 0x1e6   :  { %v458_v57 = vmax.f32 %v384_v51, 0.0 }
 0x1e7   :  { %v457_v54 = vmax.f32 %v379_v53, 0.0  ;;  %v1068_v56 = vpop.f32.mrb[2].mxu1 }
 0x1e8   :  { %v394_v55 = vadd.f32 %v1068_v56, %v843_v49  ;;  %v388_v58 = vpop.f32.mrb[3].mxu1 }
 0x1e9   :  { %v389_v59 = vadd.f32 %v843_v49, %v388_v58  ;;  %1103 = vmatprep.mubr.msk.f32.mxu1 %vm263_vm0, %v457_v54 }
 0x1ea   :  { %v460_v60 = vmax.f32 %v394_v55, 0.0  ;;  %1104 = vmatmul.mubr.msk.f32.vlgmr.msra.gmra.mrb[16].mxu1 %vm263_vm0, %v458_v57 }
 0x1eb   :  { %v459_v61 = vmax.f32 %v389_v59, 0.0  ;;  %v1071_v62 = vpop.f32.mrb[4].mxu1 }
 0x1ec   :  { %v404_v63 = vadd.f32 %v1071_v62, %v843_v49  ;;  %v398_v0 = vpop.f32.mrb[5].mxu1 }
 0x1ed   :  { %1106 = vmatprep.mubr.msk.f32.mxu1 %vm263_vm0, %v459_v61  ;;  %v399_v1 = vadd.f32 %v843_v49, %v398_v0 }
 0x1ee   :  { %v462_v2 = vmax.f32 %v404_v63, 0.0  ;;  %1107 = vmatmul.mubr.msk.f32.gmra.mrb[18].mxu1 %vm263_vm0, %v460_v60 }
 0x1ef   :  { %v461_v3 = vmax.f32 %v399_v1, 0.0  ;;  %v1074_v4 = vpop.f32.mrb[6].mxu1 }
 0x1f0   :  { %v414_v5 = vadd.f32 %v1074_v4, %v843_v49  ;;  %v408_v6 = vpop.f32.mrb[7].mxu1 }
 0x1f1   :  { %1109 = vmatprep.mubr.msk.f32.mxu1 %vm263_vm0, %v461_v3  ;;  %v409_v7 = vadd.f32 %v843_v49, %v408_v6 }
 0x1f2   :  { %1110 = vmatmul.mubr.msk.f32.gmra.mrb[20].mxu1 %vm263_vm0, %v462_v2  ;;  %v464_v8 = vmax.f32 %v414_v5, 0.0 }
 0x1f3   :  { %v463_v9 = vmax.f32 %v409_v7, 0.0  ;;  %v1077_v10 = vpop.f32.mrb[8].mxu1 }
 0x1f4   :  { %v424_v11 = vadd.f32 %v1077_v10, %v843_v49  ;;  %v418_v12 = vpop.f32.mrb[9].mxu1 }
 0x1f5   :  { %1112 = vmatprep.mubr.msk.f32.mxu1 %vm263_vm0, %v463_v9  ;;  %v419_v13 = vadd.f32 %v843_v49, %v418_v12 }
 0x1f6   :  { %1113 = vmatmul.mubr.msk.f32.gmra.mrb[22].mxu1 %vm263_vm0, %v464_v8  ;;  %v466_v14 = vmax.f32 %v424_v11, 0.0 }
 0x1f7   :  { %v465_v15 = vmax.f32 %v419_v13, 0.0  ;;  %v1080_v16 = vpop.f32.mrb[10].mxu1 }
 0x1f8   :  { %v434_v17 = vadd.f32 %v1080_v16, %v843_v49  ;;  %v428_v18 = vpop.f32.mrb[11].mxu1 }
 0x1f9   :  { %1115 = vmatprep.mubr.msk.f32.mxu1 %vm263_vm0, %v465_v15  ;;  %v429_v19 = vadd.f32 %v843_v49, %v428_v18 }
 0x1fa   :  { %1116 = vmatmul.mubr.msk.f32.gmra.mrb[24].mxu1 %vm263_vm0, %v466_v14  ;;  %v468_v20 = vmax.f32 %v434_v17, 0.0 }
 0x1fb   :  { %v467_v21 = vmax.f32 %v429_v19, 0.0  ;;  %v1083_v22 = vpop.f32.mrb[12].mxu1 }
 0x1fc   :  { %v444_v23 = vadd.f32 %v1083_v22, %v843_v49  ;;  %v438_v24 = vpop.f32.mrb[13].mxu1 }
 0x1fd   :  { %1118 = vmatprep.mubr.msk.f32.mxu1 %vm263_vm0, %v467_v21  ;;  %v439_v25 = vadd.f32 %v843_v49, %v438_v24 }
 0x1fe   :  { %1119 = vmatmul.mubr.msk.f32.gmra.mrb[26].mxu1 %vm263_vm0, %v468_v20  ;;  %v470_v26 = vmax.f32 %v444_v23, 0.0 }
 0x1ff   :  { %v469_v27 = vmax.f32 %v439_v25, 0.0  ;;  %v1086_v28 = vpop.f32.mrb[14].mxu1 }
 0x200   :  { %v454_v29 = vadd.f32 %v1086_v28, %v843_v49  ;;  %v448_v30 = vpop.f32.mrb[15].mxu1 }
 0x201   :  { %1121 = vmatprep.mubr.msk.f32.mxu1 %vm263_vm0, %v469_v27  ;;  %v449_v31 = vadd.f32 %v843_v49, %v448_v30  ;;  %v697_v30 = vld [vmem:[%s1621_s7] sm:$0x1]  ;;  %s1291_s7 = scalar_lea.vmem %s834_s19, 16 }
 0x202   :  { %1122 = vmatmul.mubr.msk.f32.gmra.mrb[28].mxu1 %vm263_vm0, %v470_v26  ;;  %v472_v32 = vmax.f32 %v454_v29, 0.0  ;;  %p1292_p8 = scmp.ne.s32.totalorder %s834_s19, %s1291_s7  ;;  %p1297_p10 = scmp.lt.s32.totalorder %s1295_s20, %s1291_s7 }
 0x203   :  { %v471_v33 = vmax.f32 %v449_v31, 0.0  ;;  %v699_v31 = vstv %s1622_s8 }
 0x204   :  { %p1298_p11 = por %p1297_p10, %p1296_p9 }
 0x205   :  { %1124 = vmatprep.mubr.msk.f32.mxu1 %vm263_vm0, %v471_v33 }
 0x206   :  { %1125 = vmatmul.mubr.msk.f32.gmra.mrb[30].mxu1 %vm263_vm0, %v472_v32  ;;  %p1299_p12 = pnand %p1298_p11, %p1292_p8 }
 0x2bd   :  { %v1105_v37 = vpop.f32.mrb[16].mxu1 }
 0x2be   :  { %v608_v38 = vadd.f32 %v1105_v37, %v860_v36  ;;  %v602_v39 = vpop.f32.mrb[17].mxu1 }
 0x2bf   :  { %v603_v40 = vadd.f32 %v860_v36, %v602_v39 }
 0x2c0   :  { %v682_v41 = vmax.f32 %v608_v38, 0.0 }
 0x2c1   :  { %v681_v42 = vmax.f32 %v603_v40, 0.0  ;;  %v1108_v43 = vpop.f32.mrb[18].mxu1 }
 0x2c2   :  { %v618_v44 = vadd.f32 %v1108_v43, %v860_v36  ;;  %v612_v45 = vpop.f32.mrb[19].mxu1 }
 0x2c3   :  { %v1227_v47 = vpack.c.bf16 %v682_v41, %v681_v42  ;;  %v613_v48 = vadd.f32 %v860_v36, %v612_v45 }
 0x2c4   :  { %v684_v49 = vmax.f32 %v618_v44, 0.0 }
 0x2c5   :  { %v683_v50 = vmax.f32 %v613_v48, 0.0  ;;  %1229 = vmatpush3.bf16.xpose.msk.msra.mxu0 %vm1568_vm2, %v1227_v47  ;;  %v1111_v51 = vpop.f32.mrb[20].mxu1 }
 0x2c6   :  { %v628_v52 = vadd.f32 %v1111_v51, %v860_v36  ;;  %v622_v53 = vpop.f32.mrb[21].mxu1  ;;  %1230 = vmatprep.subr.bf16.mxu0 %v1320_v34 }
 0x2c7   :  { %v1231_v54 = vpack.c.bf16 %v684_v49, %v683_v50  ;;  %v623_v56 = vadd.f32 %v860_v36, %v622_v53 }
 0x2c8   :  { %v686_v57 = vmax.f32 %v628_v52, 0.0 }
 0x2c9   :  { %v685_v55 = vmax.f32 %v623_v56, 0.0  ;;  %v1114_v58 = vpop.f32.mrb[22].mxu1 }
 0x2ca   :  { %v638_v59 = vadd.f32 %v1114_v58, %v860_v36  ;;  %v632_v60 = vpop.f32.mrb[23].mxu1 }
 0x2cb   :  { %v1235_v61 = vpack.c.bf16 %v686_v57, %v685_v55  ;;  %v633_v62 = vadd.f32 %v860_v36, %v632_v60 }
 0x2cc   :  { %v688_v63 = vmax.f32 %v638_v59, 0.0 }
 0x2cd   :  { %1233 = vmatpush3.bf16.xpose.msk.msra.mxu0 %vm1568_vm2, %v1231_v54  ;;  %v687_v0 = vmax.f32 %v633_v62, 0.0  ;;  %v1117_v1 = vpop.f32.mrb[24].mxu1 }
 0x2ce   :  { %1234 = vmatprep.subr.bf16.mxu0 %v1320_v34  ;;  %v648_v2 = vadd.f32 %v1117_v1, %v860_v36  ;;  %v642_v3 = vpop.f32.mrb[25].mxu1 }
 0x2cf   :  { %v1239_v4 = vpack.c.bf16 %v688_v63, %v687_v0  ;;  %v643_v5 = vadd.f32 %v860_v36, %v642_v3 }
 0x2d0   :  { %v690_v6 = vmax.f32 %v648_v2, 0.0 }
 0x2d1   :  { %v689_v7 = vmax.f32 %v643_v5, 0.0  ;;  %v1120_v8 = vpop.f32.mrb[26].mxu1 }
 0x2d2   :  { %v658_v9 = vadd.f32 %v1120_v8, %v860_v36  ;;  %v652_v10 = vpop.f32.mrb[27].mxu1 }
 0x2d3   :  { %v1243_v11 = vpack.c.bf16 %v690_v6, %v689_v7  ;;  %v653_v12 = vadd.f32 %v860_v36, %v652_v10 }
 0x2d4   :  { %v692_v13 = vmax.f32 %v658_v9, 0.0 }
 0x2d5   :  { %1237 = vmatpush3.bf16.xpose.msk.msra.mxu0 %vm1568_vm2, %v1235_v61  ;;  %v691_v14 = vmax.f32 %v653_v12, 0.0  ;;  %v1123_v15 = vpop.f32.mrb[28].mxu1 }
 0x2d6   :  { %1238 = vmatprep.subr.bf16.mxu0 %v1320_v34  ;;  %v668_v16 = vadd.f32 %v1123_v15, %v860_v36  ;;  %v662_v17 = vpop.f32.mrb[29].mxu1 }
 0x2d7   :  { %v1247_v18 = vpack.c.bf16 %v692_v13, %v691_v14  ;;  %v663_v19 = vadd.f32 %v860_v36, %v662_v17 }
 0x2d8   :  { %v694_v20 = vmax.f32 %v668_v16, 0.0 }
 0x2d9   :  { %v693_v21 = vmax.f32 %v663_v19, 0.0  ;;  %v1126_v22 = vpop.f32.mrb[30].mxu1 }
 0x2da   :  { %v678_v23 = vadd.f32 %v1126_v22, %v860_v36  ;;  %v672_v24 = vpop.f32.mrb[31].mxu1 }
 0x2db   :  { %v1251_v25 = vpack.c.bf16 %v694_v20, %v693_v21  ;;  %v673_v26 = vadd.f32 %v860_v36, %v672_v24 }
 0x2dc   :  { %v696_v27 = vmax.f32 %v678_v23, 0.0 }
 0x2dd   :  { %1241 = vmatpush3.bf16.xpose.msk.msra.mxu0 %vm1568_vm2, %v1239_v4  ;;  %v695_v28 = vmax.f32 %v673_v26, 0.0 }
 0x2de   :  { %1242 = vmatprep.subr.bf16.mxu0 %v1320_v34 }
 0x2df   :  { %v1255_v29 = vpack.c.bf16 %v696_v27, %v695_v28 }
 0x2e5   :  { %1245 = vmatpush3.bf16.xpose.msk.msra.mxu0 %vm1568_vm2, %v1243_v11 }
 0x2e6   :  { %1246 = vmatprep.subr.bf16.mxu0 %v1320_v34 }
 0x2ed   :  { %1249 = vmatpush3.bf16.xpose.msk.msra.mxu0 %vm1568_vm2, %v1247_v18 }
 0x2ee   :  { %1250 = vmatprep.subr.bf16.mxu0 %v1320_v34 }
 0x2f5   :  { %1253 = vmatpush3.bf16.xpose.msk.msra.mxu0 %vm1568_vm2, %v1251_v25 }
 0x2f6   :  { %1254 = vmatprep.subr.bf16.mxu0 %v1320_v34 }
 0x2fd   :  { %1257 = vmatpush3.bf16.xpose.msk.msra.mxu0 %vm1568_vm2, %v1255_v29 }
 0x304   :  { %1160 = vmatmul.mubr.msk.f32.vlgmr.msra.gmra.mrb[16].mxu0 %vm263_vm0, %v697_v30 }
 0x3d7   :  { %v817_v32 = vpop.f32.mrb[16].mxu0 }
 0x3d8   :  { %v818_v33 = vadd.f32 %v817_v32, %v699_v31  ;;  %v1161_v35 = vpop.f32.mrb[17].mxu0 }
 0x3da   :  { %v821_v36 = vsub.f32 0.0, %v818_v33 }
 0x3dc   :  { %v822_v37 = vmul.f32 1.442695, %v821_v36 }
 0x3de   :  { %1265 = vpow2.f32 %v822_v37 }
 0x3e8   :  { %v1266_v34 = vpop.eup %1265 }
 0x3e9   :  { %v824_v38 = vadd.f32 1.0, %v1266_v34 }
 0x3eb   :  { %1267 = vrcp.f32 %v824_v38 }
 0x3f5   :  { %v1268_v39 = vpop.eup %1267 }
 0x3f6   :  { %826 = vst [vmem:[#allocation6] sm:$0x1] %v1268_v39 }
 0x3f7   :  { %1302 = shalt.err (!%p1299_p12)
}
 0x3f8   :  { %s1303_s22 = scalar_lea.hbm %s1623_s9, 16 }
 0x3f9   :  { %p1304_p13 = scmp.ne.s32.totalorder %s1623_s9, %s1303_s22  ;;  %p1307_p0 = scmp.lt.u32.totalorder %s1303_s22, %s1623_s9 }
 0x3fb   :  { %p1309_p1 = pnand %p1307_p0, %p1304_p13 }
 0x3fd   :  { %1312 = shalt.err (!%p1309_p1)
}
 0x3fe   :  { %836 = dma.vmem_to_hbm [thread:$0]  %s834_s19, 16, %s1623_s9, [#allocation5]  }
 0x3ff   :  { %1315 = dma.done.wait [#allocation5], 16  }
 0x400   :  { %1316 = vsyncadd [#allocation5], 4294967280 }
 0x401   :  { %840 = vsyncpa [#allocation4], 1 }
 0x402   :  { %841 = vsyncpa [#allocation5], 1 }

</bundles_post_ra>
